<compile_context>
chip_gen: v6e
topology: v6e:2x2x1
jax: 0.10.0
libtpu: 0.0.40
codegen_flags: <defaults>
</compile_context>

<pallas_src>
import math
import numpy as np
import jax
import jax.numpy as jnp
from jax import lax
from jax.experimental import pallas as pl
from jax.experimental.pallas import tpu as pltpu

# ---- hyperparameters (mirror Network.__init__ arguments) --------------------
N_GRAPHS = 8                     # graphs batched per pallas_call
N_NODES  = 8
N_EDGES  = 16
F_IN     = 4                     # irreps_in  ~ "4x0e" (scalar node features)
F_OUT    = 4                     # irreps_out ~ "4x0e"
LMAX     = 1
D_SH     = (LMAX + 1) ** 2       # spherical-harmonics dim (l=0..1) = 4
MUL      = 16                    # hidden multiplicity -> hidden scalar width
MAX_RADIUS     = 2.5
NUM_BASIS      = 10
RADIAL_NEURONS = 16
NUM_NEIGHBORS  = float(N_EDGES) / float(N_NODES)
NUM_NODES_NORM = float(N_NODES)

W0 = F_IN * D_SH                 # expanded message width, layer 0 (16)
W1 = MUL * D_SH                  # expanded message width, layer 1 (64)

C_S = math.sin(math.pi / 8.0)    # skip-connection mixing constants (e3nn Convolution)
C_X = math.cos(math.pi / 8.0)


def _silu(v):
    # v * sigmoid(v); the divide goes to the (otherwise idle) EUP via approx reciprocal.
    # NOTE: ~1e-3 relative deviation vs exact sigmoid.
    return v * pl.reciprocal(1.0 + jnp.exp(-v), approx=True)


def network_kernel(
    edge_vec_ref, x_ref, z_ref, src_oh_ref, dst_oh_t_ref,
    sh_masks_ref, fc1_cat_ref, fc2_blk_ref,
    scl1_0_ref, lin2_0_ref, scl1_1_ref, lin2_1_ref,
    out_ref,
):
    f32 = jnp.float32

    # ---- edge geometry (pure VPU/EUP: no MXU, no cross-lane reduce) -----------
    edge_vec = edge_vec_ref[0]                               # (E, 3)
    vx = edge_vec[:, 0:1]                                    # (E, 1)
    vy = edge_vec[:, 1:2]
    vz = edge_vec[:, 2:3]
    sumsq = vx * vx + vy * vy + vz * vz + 1e-12
    inv_len = lax.rsqrt(sumsq)                               # (E, 1) EUP
    edge_len = sumsq * inv_len                               # (E, 1)

    # spherical harmonics (lmax=1, 'component' norm, e3nn (Y00, y, z, x) order),
    # tiled channel-major to W1 lanes via precomputed periodic masks (sqrt(3) folded in).
    m0 = sh_masks_ref[0:1, :]
    m1 = sh_masks_ref[1:2, :]
    m2 = sh_masks_ref[2:3, :]
    m3 = sh_masks_ref[3:4, :]
    sh_w = (m0 + (vy * inv_len) * m1
               + (vz * inv_len) * m2
               + (vx * inv_len) * m3)                        # (E, W1)

    # smooth_cutoff(edge_len / max_radius) via clamp (no selects)
    u = 2.0 * (edge_len * (1.0 / MAX_RADIUS) - 1.0)
    cut = 0.5 * (1.0 - jnp.cos(math.pi * jnp.clip(u, -1.0, 0.0)))
    edge_attr_w = cut * sh_w                                 # (E, W1) tiled edge attr

    # soft_one_hot_linspace(basis='gaussian', cutoff=False); normalization folded into fc1.
    step = MAX_RADIUS / (NUM_BASIS - 1)
    centers = lax.broadcasted_iota(jnp.int32, (1, NUM_BASIS), 1).astype(f32) * step
    diff = (edge_len - centers) * (1.0 / step)
    edge_len_emb = jnp.exp(-(diff * diff))                   # (E, NUM_BASIS)

    # radial network for BOTH conv layers, fused (shared LHS + block-diag second FC).
    h = _silu(jnp.dot(edge_len_emb, fc1_cat_ref[...],
                      preferred_element_type=f32))           # (E, 2*RADIAL_NEURONS)
    w_cat = jnp.dot(h, fc2_blk_ref[...],
                    preferred_element_type=f32)              # (E, W1 + W0), W1 block first

    # per-edge (edge_attr * tensor-product weight) factors, hoisted off the
    # node-feature-dependent critical path.  Hot slices start at lane 0.
    ew_1 = edge_attr_w * w_cat[:, :W1]                       # (E, W1)
    ew_0 = edge_attr_w[:, :W0] * w_cat[:, W1:]               # (E, W0)

    src_oh = src_oh_ref[0]                                   # (E, N) precomputed one-hot
    dst_oh_t = dst_oh_t_ref[0]                               # (N, E)
    x = x_ref[0]                                             # (N, F_IN)
    z = z_ref[0]                                             # (N, 1), "0e" node attr

    def convolution(x_in, scl1, lin2, ew, w_exp):
        # scl1 = [ 1/sqrt(d_in) * (lin1 @ r) | C_S/sqrt(d_in) * sc ]  (scales pre-folded)
        xz = x_in * z
        res = jnp.dot(xz, scl1, preferred_element_type=f32)  # (N, w_exp + d_out)
        xl_exp = res[:, :w_exp]                              # lin1 output, pre-expanded (lane 0)
        s = res[:, w_exp:]                                   # self connection (cold tail)
        # gather node features onto edges; 'uvu'-style weighted product with edge_attr.
        x_src = jnp.dot(src_oh, xl_exp, preferred_element_type=f32)   # (E, w_exp)
        msg = x_src * ew
        # TODO(synk): exact e3nn Clebsch-Gordan contraction / path-normalization for l>0
        # product channels is not performed; raw outer-product channels are kept.
        # lin2 before scatter (exact: matrix associativity; z row-scale commutes).
        m_out = jnp.dot(msg, lin2, preferred_element_type=f32)        # (E, d_out)
        agg = jnp.dot(dst_oh_t, m_out, preferred_element_type=f32)    # (N, d_out)
        # skip connection; C_S/C_X and 1/sqrt(num_neighbors) already folded into weights.
        # TODO(synk): e3nn uses sc.output_mask to blend c_x; assumed all-ones here.
        return s + agg * z

    # layer 0: CustomCompose(Convolution, Gate)
    h0 = convolution(x, scl1_0_ref[...], lin2_0_ref[...], ew_0, W0)
    # TODO(synk): e3nn Gate (silu/tanh on scalars + sigmoid gates for l>0 irreps) simplified
    # to SiLU on the scalar hidden channels.
    h0 = _silu(h0)

    # final layer: Convolution to irreps_out (1/sqrt(num_nodes) folded into its weights)
    h1 = convolution(h0, scl1_1_ref[...], lin2_1_ref[...], ew_1, W1)

    # reduce_output=True: per-graph sum over nodes (node norm already folded in).
    out_ref[0] = jnp.sum(h1, axis=0, keepdims=True)          # (1, F_OUT)


def network_forward(edge_vec, x, z, src_oh, dst_oh_t, params):
    B = edge_vec.shape[0]

    def per_graph(trailing):
        zeros = (0,) * len(trailing)
        return pl.BlockSpec((1,) + tuple(trailing), lambda b, _z=zeros: (b,) + _z)

    def shared(shape):
        n = len(shape)
        return pl.BlockSpec(tuple(shape), lambda b, _n=n: (0,) * _n)

    in_specs = [
        per_graph((N_EDGES, 3)),              # edge_vec
        per_graph((N_NODES, F_IN)),           # x
        per_graph((N_NODES, 1)),              # z
        per_graph((N_EDGES, N_NODES)),        # src_oh
        per_graph((N_NODES, N_EDGES)),        # dst_oh_t
        shared((4, W1)),                      # sh_masks
        shared((NUM_BASIS, 2 * RADIAL_NEURONS)),   # fc1_cat
        shared((2 * RADIAL_NEURONS, W1 + W0)),     # fc2_blk
        shared((F_IN, W0 + MUL)),             # scl1_0
        shared((W0, MUL)),                    # lin2_0
        shared((MUL, W1 + F_OUT)),            # scl1_1
        shared((W1, F_OUT)),                  # lin2_1
    ]
    out_specs = pl.BlockSpec((1, 1, F_OUT), lambda b: (b, 0, 0))

    out = pl.pallas_call(
        network_kernel,
        grid=(B,),
        out_shape=jax.ShapeDtypeStruct((B, 1, F_OUT), jnp.float32),
        in_specs=in_specs,
        out_specs=out_specs,
        compiler_params=pltpu.CompilerParams(
            dimension_semantics=("parallel",)),
        cost_estimate=pl.CostEstimate(
            flops=160_000 * B, transcendentals=1_024 * B, bytes_accessed=8_192 * B),
    )(edge_vec, x, z, src_oh, dst_oh_t, *params)
    return out.reshape(B, F_OUT)


def build_params(key):
    d_hid = MUL
    shapes = [
        (NUM_BASIS, RADIAL_NEURONS), (RADIAL_NEURONS, W0),            # layer0 radial MLP
        (F_IN, F_IN), (W0, d_hid), (F_IN, d_hid),                     # layer0 lin1, lin2, sc
        (NUM_BASIS, RADIAL_NEURONS), (RADIAL_NEURONS, W1),            # layer1 radial MLP
        (d_hid, d_hid), (W1, F_OUT), (d_hid, F_OUT),                  # layer1 lin1, lin2, sc
    ]
    keys = jax.random.split(key, len(shapes))
    (fc1_0, fc2_0, lin1_0, lin2_0, sc_0,
     fc1_1, fc2_1, lin1_1, lin2_1, sc_1) = [
        np.asarray(jax.random.normal(k, s, jnp.float32)) for k, s in zip(keys, shapes)]

    # --- precompose the constant identity-expansion operators into lin1 (channel-major) ---
    r_0 = np.repeat(np.eye(F_IN, dtype=np.float32), D_SH, axis=1)     # (F_IN,  W0)
    r_1 = np.repeat(np.eye(d_hid, dtype=np.float32), D_SH, axis=1)    # (d_hid, W1)
    lin1r_0 = lin1_0 @ r_0
    lin1r_1 = lin1_1 @ r_1

    # --- fold all constant scales / skip-connection blend into the weights ---------------
    inv_in0 = 1.0 / math.sqrt(F_IN)
    inv_in1 = 1.0 / math.sqrt(d_hid)
    node_norm = 1.0 / math.sqrt(NUM_NODES_NORM)

    # hot block (lin1r, feeds gather matmul) at lane 0; self-connection at the tail.
    scl1_0 = np.concatenate([inv_in0 * lin1r_0,
                             C_S * inv_in0 * sc_0], axis=1)                         # (4, 32)
    scl1_1 = np.concatenate([inv_in1 * lin1r_1,
                             C_S * inv_in1 * node_norm * sc_1], axis=1)             # (16, 68)

    lin2_0s = lin2_0 * (C_X / (math.sqrt(NUM_NEIGHBORS) * math.sqrt(W0)))
    lin2_1s = lin2_1 * (C_X * node_norm /
                        (math.sqrt(NUM_NEIGHBORS) * math.sqrt(W1)))

    # radial MLP: shared-LHS concat of both first FCs (gaussian normalization folded in),
    # block-diagonal concat of both second FCs (1/sqrt(hr) folded in), W1 block first.
    emb_norm = (float(NUM_BASIS) ** 0.5 / 1.12) / math.sqrt(NUM_BASIS)    # = 1/1.12
    fc1_cat = np.concatenate([fc1_0, fc1_1], axis=1) * emb_norm           # (10, 2R)
    inv_hr = 1.0 / math.sqrt(RADIAL_NEURONS)
    fc2_blk = np.zeros((2 * RADIAL_NEURONS, W1 + W0), np.float32)
    fc2_blk[:RADIAL_NEURONS, W1:] = fc2_0 * inv_hr          # layer-0 block -> tail lanes
    fc2_blk[RADIAL_NEURONS:, :W1] = fc2_1 * inv_hr          # layer-1 block -> lane 0

    # real spherical harmonics (lmax=1, 'component' norm, e3nn l=1 order (y,z,x)):
    # periodic lane masks (period D_SH) with sqrt(3) folded in, tiled to W1 lanes.
    s3 = math.sqrt(3.0)
    lane = np.arange(W1)
    sh_masks = np.zeros((4, W1), np.float32)
    sh_masks[0, lane % D_SH == 0] = 1.0    # Y_00 (constant)
    sh_masks[1, lane % D_SH == 1] = s3     # y-hat
    sh_masks[2, lane % D_SH == 2] = s3     # z-hat
    sh_masks[3, lane % D_SH == 3] = s3     # x-hat

    return tuple(jnp.asarray(a) for a in
                 (sh_masks, fc1_cat, fc2_blk, scl1_0, lin2_0s, scl1_1, lin2_1s))


if __name__ == "__main__":
    key = jax.random.PRNGKey(0)
    k_pos, k_x, k_par = jax.random.split(key, 3)

    B = N_GRAPHS
    pos = np.asarray(jax.random.normal(k_pos, (B, N_NODES, 3), jnp.float32)) * 0.8
    x = jax.random.normal(k_x, (B, N_NODES, F_IN), jnp.float32)        # data['x']
    z = jnp.ones((B, N_NODES, 1), jnp.float32)                          # irreps_node_attr = "0e"

    # deterministic edge list (the data['edge_index'] path of Network.preprocess),
    # same connectivity for every graph, different positions.
    base = np.arange(N_NODES)
    src_np = np.concatenate([base, base]).astype(np.int32)
    dst_np = np.concatenate([(base + 1) % N_NODES, (base + 3) % N_NODES]).astype(np.int32)
    assert src_np.shape[0] == N_EDGES
    src_b = np.broadcast_to(src_np, (B, N_EDGES))
    dst_b = np.broadcast_to(dst_np, (B, N_EDGES))

    bidx = np.arange(B)[:, None]
    edge_vec = pos[bidx, src_b] - pos[bidx, dst_b]                       # (B, E, 3)

    # precomputed one-hot gather/scatter operators (static edge list -> host side)
    src_oh = (src_b[:, :, None] == np.arange(N_NODES)[None, None, :]).astype(np.float32)
    dst_oh_t = (np.arange(N_NODES)[None, :, None] == dst_b[:, None, :]).astype(np.float32)

    params = build_params(k_par)
    out = network_forward(jnp.asarray(edge_vec), x, z,
                          jnp.asarray(src_oh), jnp.asarray(dst_oh_t), params)
    jax.block_until_ready(out)
    assert out.shape == (B, F_OUT) and out.dtype == jnp.float32
    assert bool(jnp.all(jnp.isfinite(out)))
    print("KERNEL_OK")
</pallas_src>

<mosaic_0001>
module attributes {stable_mosaic.version = 11 : i64} {
  func.func @network_kernel(%arg0: i32, %arg1: memref<1x16x3xf32, #tpu.memory_space<vmem>>, %arg2: memref<1x8x4xf32, #tpu.memory_space<vmem>>, %arg3: memref<1x8x1xf32, #tpu.memory_space<vmem>>, %arg4: memref<1x16x8xf32, #tpu.memory_space<vmem>>, %arg5: memref<1x8x16xf32, #tpu.memory_space<vmem>>, %arg6: memref<4x64xf32, #tpu.memory_space<vmem>>, %arg7: memref<10x32xf32, #tpu.memory_space<vmem>>, %arg8: memref<32x80xf32, #tpu.memory_space<vmem>>, %arg9: memref<4x32xf32, #tpu.memory_space<vmem>>, %arg10: memref<16x16xf32, #tpu.memory_space<vmem>>, %arg11: memref<16x68xf32, #tpu.memory_space<vmem>>, %arg12: memref<64x4xf32, #tpu.memory_space<vmem>>, %arg13: memref<1x1x4xf32, #tpu.memory_space<vmem>>) attributes {dimension_semantics = [#tpu.dimension_semantics<parallel>], iteration_bounds = array<i64: 8>, scalar_prefetch = 0 : i64, scratch_operands = 0 : i64, tpu.core_type = #tpu.core_type<tc>, window_params = [{transform_indices = @transform_0, window_bounds = array<i64: 1, 16, 3>}, {transform_indices = @transform_1, window_bounds = array<i64: 1, 8, 4>}, {transform_indices = @transform_2, window_bounds = array<i64: 1, 8, 1>}, {transform_indices = @transform_3, window_bounds = array<i64: 1, 16, 8>}, {transform_indices = @transform_4, window_bounds = array<i64: 1, 8, 16>}, {pipeline_mode = #tpu.pipeline_mode<synchronous>, transform_indices = @transform_5, window_bounds = array<i64: 4, 64>}, {pipeline_mode = #tpu.pipeline_mode<synchronous>, transform_indices = @transform_6, window_bounds = array<i64: 10, 32>}, {pipeline_mode = #tpu.pipeline_mode<synchronous>, transform_indices = @transform_7, window_bounds = array<i64: 32, 80>}, {pipeline_mode = #tpu.pipeline_mode<synchronous>, transform_indices = @transform_8, window_bounds = array<i64: 4, 32>}, {pipeline_mode = #tpu.pipeline_mode<synchronous>, transform_indices = @transform_9, window_bounds = array<i64: 16, 16>}, {pipeline_mode = #tpu.pipeline_mode<synchronous>, transform_indices = @transform_10, window_bounds = array<i64: 16, 68>}, {pipeline_mode = #tpu.pipeline_mode<synchronous>, transform_indices = @transform_11, window_bounds = array<i64: 64, 4>}, {transform_indices = @transform_12, window_bounds = array<i64: 1, 1, 4>}]} {
    %c0 = arith.constant 0 : index
    %c0_0 = arith.constant 0 : index
    %c0_1 = arith.constant 0 : index
    %0 = vector.load %arg1[%c0, %c0_0, %c0_1] : memref<1x16x3xf32, #tpu.memory_space<vmem>>, vector<1x16x3xf32>
    %1 = vector.shape_cast %0 : vector<1x16x3xf32> to vector<16x3xf32>
    %2 = vector.extract_strided_slice %1 {offsets = [0, 0], sizes = [16, 1], strides = [1, 1]} : vector<16x3xf32> to vector<16x1xf32>
    %3 = vector.extract_strided_slice %1 {offsets = [0, 1], sizes = [16, 1], strides = [1, 1]} : vector<16x3xf32> to vector<16x1xf32>
    %4 = vector.extract_strided_slice %1 {offsets = [0, 2], sizes = [16, 1], strides = [1, 1]} : vector<16x3xf32> to vector<16x1xf32>
    %5 = arith.mulf %2, %2 : vector<16x1xf32>
    %6 = arith.mulf %3, %3 : vector<16x1xf32>
    %7 = arith.addf %5, %6 : vector<16x1xf32>
    %8 = arith.mulf %4, %4 : vector<16x1xf32>
    %9 = arith.addf %7, %8 : vector<16x1xf32>
    %cst = arith.constant 9.99999996E-13 : f32
    %10 = vector.broadcast %cst : f32 to vector<16x1xf32>
    %11 = arith.addf %9, %10 : vector<16x1xf32>
    %12 = math.rsqrt %11 : vector<16x1xf32>
    %13 = arith.mulf %11, %12 : vector<16x1xf32>
    %c0_2 = arith.constant 0 : index
    %c0_3 = arith.constant 0 : index
    %14 = vector.load %arg6[%c0_2, %c0_3] : memref<4x64xf32, #tpu.memory_space<vmem>>, vector<1x64xf32>
    %c1 = arith.constant 1 : index
    %c0_4 = arith.constant 0 : index
    %15 = vector.load %arg6[%c1, %c0_4] : memref<4x64xf32, #tpu.memory_space<vmem>>, vector<1x64xf32>
    %c2 = arith.constant 2 : index
    %c0_5 = arith.constant 0 : index
    %16 = vector.load %arg6[%c2, %c0_5] : memref<4x64xf32, #tpu.memory_space<vmem>>, vector<1x64xf32>
    %c3 = arith.constant 3 : index
    %c0_6 = arith.constant 0 : index
    %17 = vector.load %arg6[%c3, %c0_6] : memref<4x64xf32, #tpu.memory_space<vmem>>, vector<1x64xf32>
    %18 = arith.mulf %3, %12 : vector<16x1xf32>
    %19 = vector.broadcast %18 : vector<16x1xf32> to vector<16x64xf32>
    %20 = vector.broadcast %15 : vector<1x64xf32> to vector<16x64xf32>
    %21 = arith.mulf %19, %20 : vector<16x64xf32>
    %22 = vector.broadcast %14 : vector<1x64xf32> to vector<16x64xf32>
    %23 = arith.addf %22, %21 : vector<16x64xf32>
    %24 = arith.mulf %4, %12 : vector<16x1xf32>
    %25 = vector.broadcast %24 : vector<16x1xf32> to vector<16x64xf32>
    %26 = vector.broadcast %16 : vector<1x64xf32> to vector<16x64xf32>
    %27 = arith.mulf %25, %26 : vector<16x64xf32>
    %28 = arith.addf %23, %27 : vector<16x64xf32>
    %29 = arith.mulf %2, %12 : vector<16x1xf32>
    %30 = vector.broadcast %29 : vector<16x1xf32> to vector<16x64xf32>
    %31 = vector.broadcast %17 : vector<1x64xf32> to vector<16x64xf32>
    %32 = arith.mulf %30, %31 : vector<16x64xf32>
    %33 = arith.addf %28, %32 : vector<16x64xf32>
    %cst_7 = arith.constant 4.000000e-01 : f32
    %34 = vector.broadcast %cst_7 : f32 to vector<16x1xf32>
    %35 = arith.mulf %13, %34 : vector<16x1xf32>
    %cst_8 = arith.constant 1.000000e+00 : f32
    %36 = vector.broadcast %cst_8 : f32 to vector<16x1xf32>
    %37 = arith.subf %35, %36 : vector<16x1xf32>
    %cst_9 = arith.constant 2.000000e+00 : f32
    %38 = vector.broadcast %cst_9 : f32 to vector<16x1xf32>
    %39 = arith.mulf %38, %37 : vector<16x1xf32>
    %cst_10 = arith.constant -1.000000e+00 : f32
    %cst_11 = arith.constant 0.000000e+00 : f32
    %40 = vector.broadcast %cst_10 : f32 to vector<16x1xf32>
    %41 = arith.maximumf %40, %39 : vector<16x1xf32>
    %42 = vector.broadcast %cst_11 : f32 to vector<16x1xf32>
    %43 = arith.minimumf %42, %41 : vector<16x1xf32>
    %cst_12 = arith.constant 3.14159274 : f32
    %44 = vector.broadcast %cst_12 : f32 to vector<16x1xf32>
    %45 = arith.mulf %44, %43 : vector<16x1xf32>
    %46 = math.cos %45 : vector<16x1xf32>
    %cst_13 = arith.constant 1.000000e+00 : f32
    %47 = vector.broadcast %cst_13 : f32 to vector<16x1xf32>
    %48 = arith.subf %47, %46 : vector<16x1xf32>
    %cst_14 = arith.constant 5.000000e-01 : f32
    %49 = vector.broadcast %cst_14 : f32 to vector<16x1xf32>
    %50 = arith.mulf %49, %48 : vector<16x1xf32>
    %51 = vector.broadcast %50 : vector<16x1xf32> to vector<16x64xf32>
    %52 = arith.mulf %51, %33 : vector<16x64xf32>
    %53 = tpu.iota {dimensions = array<i32: 1>} : vector<1x10xi32>
    %54 = arith.sitofp %53 : vector<1x10xi32> to vector<1x10xf32>
    %cst_15 = arith.constant 0.277777791 : f32
    %55 = vector.broadcast %cst_15 : f32 to vector<1x10xf32>
    %56 = arith.mulf %54, %55 : vector<1x10xf32>
    %57 = vector.broadcast %13 : vector<16x1xf32> to vector<16x10xf32>
    %58 = vector.broadcast %56 : vector<1x10xf32> to vector<16x10xf32>
    %59 = arith.subf %57, %58 : vector<16x10xf32>
    %cst_16 = arith.constant 3.600000e+00 : f32
    %60 = vector.broadcast %cst_16 : f32 to vector<16x10xf32>
    %61 = arith.mulf %59, %60 : vector<16x10xf32>
    %62 = arith.mulf %61, %61 : vector<16x10xf32>
    %cst_17 = arith.constant 0.000000e+00 : f32
    %63 = vector.broadcast %cst_17 : f32 to vector<16x10xf32>
    %64 = arith.subf %63, %62 : vector<16x10xf32>
    %65 = math.exp %64 : vector<16x10xf32>
    %c0_18 = arith.constant 0 : index
    %c0_19 = arith.constant 0 : index
    %66 = vector.load %arg7[%c0_18, %c0_19] : memref<10x32xf32, #tpu.memory_space<vmem>>, vector<10x32xf32>
    %cst_20 = arith.constant dense<0.000000e+00> : vector<16x32xf32>
    %67 = tpu.matmul %65, %66, %cst_20 {dimension_numbers = #tpu.dot_dimension_numbers<[1], [0], [0], [1], [0, 0, 1, 1], [], []>} : vector<16x10xf32>, vector<10x32xf32>, vector<16x32xf32> -> vector<16x32xf32>
    %cst_21 = arith.constant 0.000000e+00 : f32
    %68 = vector.broadcast %cst_21 : f32 to vector<16x32xf32>
    %69 = arith.subf %68, %67 : vector<16x32xf32>
    %70 = math.exp %69 : vector<16x32xf32>
    %cst_22 = arith.constant 1.000000e+00 : f32
    %71 = vector.broadcast %cst_22 : f32 to vector<16x32xf32>
    %72 = arith.addf %71, %70 : vector<16x32xf32>
    %73 = tpu.reciprocal %72 {approx = true} : vector<16x32xf32> -> vector<16x32xf32>
    %74 = arith.mulf %67, %73 : vector<16x32xf32>
    %c0_23 = arith.constant 0 : index
    %c0_24 = arith.constant 0 : index
    %75 = vector.load %arg8[%c0_23, %c0_24] : memref<32x80xf32, #tpu.memory_space<vmem>>, vector<32x80xf32>
    %cst_25 = arith.constant dense<0.000000e+00> : vector<16x80xf32>
    %76 = tpu.matmul %74, %75, %cst_25 {dimension_numbers = #tpu.dot_dimension_numbers<[1], [0], [0], [1], [0, 0, 1, 1], [], []>} : vector<16x32xf32>, vector<32x80xf32>, vector<16x80xf32> -> vector<16x80xf32>
    %77 = vector.extract_strided_slice %76 {offsets = [0, 0], sizes = [16, 64], strides = [1, 1]} : vector<16x80xf32> to vector<16x64xf32>
    %78 = arith.mulf %52, %77 : vector<16x64xf32>
    %79 = vector.extract_strided_slice %52 {offsets = [0, 0], sizes = [16, 16], strides = [1, 1]} : vector<16x64xf32> to vector<16x16xf32>
    %80 = vector.extract_strided_slice %76 {offsets = [0, 64], sizes = [16, 16], strides = [1, 1]} : vector<16x80xf32> to vector<16x16xf32>
    %81 = arith.mulf %79, %80 : vector<16x16xf32>
    %c0_26 = arith.constant 0 : index
    %c0_27 = arith.constant 0 : index
    %c0_28 = arith.constant 0 : index
    %82 = vector.load %arg4[%c0_26, %c0_27, %c0_28] : memref<1x16x8xf32, #tpu.memory_space<vmem>>, vector<1x16x8xf32>
    %83 = vector.shape_cast %82 : vector<1x16x8xf32> to vector<16x8xf32>
    %c0_29 = arith.constant 0 : index
    %c0_30 = arith.constant 0 : index
    %c0_31 = arith.constant 0 : index
    %84 = vector.load %arg5[%c0_29, %c0_30, %c0_31] : memref<1x8x16xf32, #tpu.memory_space<vmem>>, vector<1x8x16xf32>
    %85 = vector.shape_cast %84 : vector<1x8x16xf32> to vector<8x16xf32>
    %c0_32 = arith.constant 0 : index
    %c0_33 = arith.constant 0 : index
    %c0_34 = arith.constant 0 : index
    %86 = vector.load %arg2[%c0_32, %c0_33, %c0_34] : memref<1x8x4xf32, #tpu.memory_space<vmem>>, vector<1x8x4xf32>
    %87 = vector.shape_cast %86 : vector<1x8x4xf32> to vector<8x4xf32>
    %c0_35 = arith.constant 0 : index
    %c0_36 = arith.constant 0 : index
    %c0_37 = arith.constant 0 : index
    %88 = vector.load %arg3[%c0_35, %c0_36, %c0_37] : memref<1x8x1xf32, #tpu.memory_space<vmem>>, vector<1x8x1xf32>
    %89 = vector.shape_cast %88 : vector<1x8x1xf32> to vector<8x1xf32>
    %c0_38 = arith.constant 0 : index
    %c0_39 = arith.constant 0 : index
    %90 = vector.load %arg9[%c0_38, %c0_39] : memref<4x32xf32, #tpu.memory_space<vmem>>, vector<4x32xf32>
    %c0_40 = arith.constant 0 : index
    %c0_41 = arith.constant 0 : index
    %91 = vector.load %arg10[%c0_40, %c0_41] : memref<16x16xf32, #tpu.memory_space<vmem>>, vector<16x16xf32>
    %92 = vector.broadcast %89 : vector<8x1xf32> to vector<8x4xf32>
    %93 = arith.mulf %87, %92 : vector<8x4xf32>
    %cst_42 = arith.constant dense<0.000000e+00> : vector<8x32xf32>
    %94 = tpu.matmul %93, %90, %cst_42 {dimension_numbers = #tpu.dot_dimension_numbers<[1], [0], [0], [1], [0, 0, 1, 1], [], []>} : vector<8x4xf32>, vector<4x32xf32>, vector<8x32xf32> -> vector<8x32xf32>
    %95 = vector.extract_strided_slice %94 {offsets = [0, 0], sizes = [8, 16], strides = [1, 1]} : vector<8x32xf32> to vector<8x16xf32>
    %96 = vector.extract_strided_slice %94 {offsets = [0, 16], sizes = [8, 16], strides = [1, 1]} : vector<8x32xf32> to vector<8x16xf32>
    %cst_43 = arith.constant dense<0.000000e+00> : vector<16x16xf32>
    %97 = tpu.matmul %83, %95, %cst_43 {dimension_numbers = #tpu.dot_dimension_numbers<[1], [0], [0], [1], [0, 0, 1, 1], [], []>} : vector<16x8xf32>, vector<8x16xf32>, vector<16x16xf32> -> vector<16x16xf32>
    %98 = arith.mulf %97, %81 : vector<16x16xf32>
    %cst_44 = arith.constant dense<0.000000e+00> : vector<16x16xf32>
    %99 = tpu.matmul %98, %91, %cst_44 {dimension_numbers = #tpu.dot_dimension_numbers<[1], [0], [0], [1], [0, 0, 1, 1], [], []>} : vector<16x16xf32>, vector<16x16xf32>, vector<16x16xf32> -> vector<16x16xf32>
    %cst_45 = arith.constant dense<0.000000e+00> : vector<8x16xf32>
    %100 = tpu.matmul %85, %99, %cst_45 {dimension_numbers = #tpu.dot_dimension_numbers<[1], [0], [0], [1], [0, 0, 1, 1], [], []>} : vector<8x16xf32>, vector<16x16xf32>, vector<8x16xf32> -> vector<8x16xf32>
    %101 = vector.broadcast %89 : vector<8x1xf32> to vector<8x16xf32>
    %102 = arith.mulf %100, %101 : vector<8x16xf32>
    %103 = arith.addf %96, %102 : vector<8x16xf32>
    %cst_46 = arith.constant 0.000000e+00 : f32
    %104 = vector.broadcast %cst_46 : f32 to vector<8x16xf32>
    %105 = arith.subf %104, %103 : vector<8x16xf32>
    %106 = math.exp %105 : vector<8x16xf32>
    %cst_47 = arith.constant 1.000000e+00 : f32
    %107 = vector.broadcast %cst_47 : f32 to vector<8x16xf32>
    %108 = arith.addf %107, %106 : vector<8x16xf32>
    %109 = tpu.reciprocal %108 {approx = true} : vector<8x16xf32> -> vector<8x16xf32>
    %110 = arith.mulf %103, %109 : vector<8x16xf32>
    %c0_48 = arith.constant 0 : index
    %c0_49 = arith.constant 0 : index
    %111 = vector.load %arg11[%c0_48, %c0_49] : memref<16x68xf32, #tpu.memory_space<vmem>>, vector<16x68xf32>
    %c0_50 = arith.constant 0 : index
    %c0_51 = arith.constant 0 : index
    %112 = vector.load %arg12[%c0_50, %c0_51] : memref<64x4xf32, #tpu.memory_space<vmem>>, vector<64x4xf32>
    %113 = vector.broadcast %89 : vector<8x1xf32> to vector<8x16xf32>
    %114 = arith.mulf %110, %113 : vector<8x16xf32>
    %cst_52 = arith.constant dense<0.000000e+00> : vector<8x68xf32>
    %115 = tpu.matmul %114, %111, %cst_52 {dimension_numbers = #tpu.dot_dimension_numbers<[1], [0], [0], [1], [0, 0, 1, 1], [], []>} : vector<8x16xf32>, vector<16x68xf32>, vector<8x68xf32> -> vector<8x68xf32>
    %116 = vector.extract_strided_slice %115 {offsets = [0, 0], sizes = [8, 64], strides = [1, 1]} : vector<8x68xf32> to vector<8x64xf32>
    %117 = vector.extract_strided_slice %115 {offsets = [0, 64], sizes = [8, 4], strides = [1, 1]} : vector<8x68xf32> to vector<8x4xf32>
    %cst_53 = arith.constant dense<0.000000e+00> : vector<16x64xf32>
    %118 = tpu.matmul %83, %116, %cst_53 {dimension_numbers = #tpu.dot_dimension_numbers<[1], [0], [0], [1], [0, 0, 1, 1], [], []>} : vector<16x8xf32>, vector<8x64xf32>, vector<16x64xf32> -> vector<16x64xf32>
    %119 = arith.mulf %118, %78 : vector<16x64xf32>
    %cst_54 = arith.constant dense<0.000000e+00> : vector<16x4xf32>
    %120 = tpu.matmul %119, %112, %cst_54 {dimension_numbers = #tpu.dot_dimension_numbers<[1], [0], [0], [1], [0, 0, 1, 1], [], []>} : vector<16x64xf32>, vector<64x4xf32>, vector<16x4xf32> -> vector<16x4xf32>
    %cst_55 = arith.constant dense<0.000000e+00> : vector<8x4xf32>
    %121 = tpu.matmul %85, %120, %cst_55 {dimension_numbers = #tpu.dot_dimension_numbers<[1], [0], [0], [1], [0, 0, 1, 1], [], []>} : vector<8x16xf32>, vector<16x4xf32>, vector<8x4xf32> -> vector<8x4xf32>
    %122 = vector.broadcast %89 : vector<8x1xf32> to vector<8x4xf32>
    %123 = arith.mulf %121, %122 : vector<8x4xf32>
    %124 = arith.addf %117, %123 : vector<8x4xf32>
    %cst_56 = arith.constant dense<0.000000e+00> : vector<4xf32>
    %125 = vector.multi_reduction <add>, %124, %cst_56 [0] : vector<8x4xf32> to vector<4xf32>
    %126 = vector.shape_cast %125 : vector<4xf32> to vector<1x4xf32>
    %c0_57 = arith.constant 0 : index
    %c0_58 = arith.constant 0 : index
    %c0_59 = arith.constant 0 : index
    %127 = vector.load %arg13[%c0_57, %c0_58, %c0_59] : memref<1x1x4xf32, #tpu.memory_space<vmem>>, vector<1x1x4xf32>
    %128 = vector.shape_cast %127 : vector<1x1x4xf32> to vector<1x4xf32>
    %129 = vector.shape_cast %126 : vector<1x4xf32> to vector<1x1x4xf32>
    tpu.vector_store %arg13[%c0_57, %c0_58, %c0_59], %129 {strides = array<i32>} : memref<1x1x4xf32, #tpu.memory_space<vmem>>, vector<1x1x4xf32>,
    return
  }
  func.func @transform_0(%arg0: i32) -> (i32, i32, i32) {
    %c0_i32 = arith.constant 0 : i32
    %c0_i32_0 = arith.constant 0 : i32
    %c0_i32_1 = arith.constant 0 : i32
    return %arg0, %c0_i32, %c0_i32_0 : i32, i32, i32
  }
  func.func @transform_1(%arg0: i32) -> (i32, i32, i32) {
    %c0_i32 = arith.constant 0 : i32
    %c0_i32_0 = arith.constant 0 : i32
    %c0_i32_1 = arith.constant 0 : i32
    return %arg0, %c0_i32, %c0_i32_0 : i32, i32, i32
  }
  func.func @transform_2(%arg0: i32) -> (i32, i32, i32) {
    %c0_i32 = arith.constant 0 : i32
    %c0_i32_0 = arith.constant 0 : i32
    %c0_i32_1 = arith.constant 0 : i32
    return %arg0, %c0_i32, %c0_i32_0 : i32, i32, i32
  }
  func.func @transform_3(%arg0: i32) -> (i32, i32, i32) {
    %c0_i32 = arith.constant 0 : i32
    %c0_i32_0 = arith.constant 0 : i32
    %c0_i32_1 = arith.constant 0 : i32
    return %arg0, %c0_i32, %c0_i32_0 : i32, i32, i32
  }
  func.func @transform_4(%arg0: i32) -> (i32, i32, i32) {
    %c0_i32 = arith.constant 0 : i32
    %c0_i32_0 = arith.constant 0 : i32
    %c0_i32_1 = arith.constant 0 : i32
    return %arg0, %c0_i32, %c0_i32_0 : i32, i32, i32
  }
  func.func @transform_5(%arg0: i32) -> (i32, i32) {
    %c0_i32 = arith.constant 0 : i32
    %c0_i32_0 = arith.constant 0 : i32
    %c0_i32_1 = arith.constant 0 : i32
    return %c0_i32, %c0_i32_0 : i32, i32
  }
  func.func @transform_6(%arg0: i32) -> (i32, i32) {
    %c0_i32 = arith.constant 0 : i32
    %c0_i32_0 = arith.constant 0 : i32
    %c0_i32_1 = arith.constant 0 : i32
    return %c0_i32, %c0_i32_0 : i32, i32
  }
  func.func @transform_7(%arg0: i32) -> (i32, i32) {
    %c0_i32 = arith.constant 0 : i32
    %c0_i32_0 = arith.constant 0 : i32
    %c0_i32_1 = arith.constant 0 : i32
    return %c0_i32, %c0_i32_0 : i32, i32
  }
  func.func @transform_8(%arg0: i32) -> (i32, i32) {
    %c0_i32 = arith.constant 0 : i32
    %c0_i32_0 = arith.constant 0 : i32
    %c0_i32_1 = arith.constant 0 : i32
    return %c0_i32, %c0_i32_0 : i32, i32
  }
  func.func @transform_9(%arg0: i32) -> (i32, i32) {
    %c0_i32 = arith.constant 0 : i32
    %c0_i32_0 = arith.constant 0 : i32
    %c0_i32_1 = arith.constant 0 : i32
    return %c0_i32, %c0_i32_0 : i32, i32
  }
  func.func @transform_10(%arg0: i32) -> (i32, i32) {
    %c0_i32 = arith.constant 0 : i32
    %c0_i32_0 = arith.constant 0 : i32
    %c0_i32_1 = arith.constant 0 : i32
    return %c0_i32, %c0_i32_0 : i32, i32
  }
  func.func @transform_11(%arg0: i32) -> (i32, i32) {
    %c0_i32 = arith.constant 0 : i32
    %c0_i32_0 = arith.constant 0 : i32
    %c0_i32_1 = arith.constant 0 : i32
    return %c0_i32, %c0_i32_0 : i32, i32
  }
  func.func @transform_12(%arg0: i32) -> (i32, i32, i32) {
    %c0_i32 = arith.constant 0 : i32
    %c0_i32_0 = arith.constant 0 : i32
    %c0_i32_1 = arith.constant 0 : i32
    return %arg0, %c0_i32, %c0_i32_0 : i32, i32, i32
  }
}

</mosaic_0001>

<bundles_post_ra>
// kernel: tpu_custom_call.1
= control target key start
LH: loop header
LB: loop body
LE: loop exit
PB: predicated region body
PF: predicated region fallthrough
CT: control target
= control target key end

     0   :  { %s2152_s21 = smov 0   ;;  %s2459_s0 = inlined_call_operand.vmem [shape: f32[8,16,3], index: 0, kind: input, shape index: {}]   ;;  %s2460_s1 = inlined_call_operand.vmem [shape: f32[8,8,4], index: 1, kind: input, shape index: {}]   ;;  %s2461_s2 = inlined_call_operand.vmem [shape: f32[8,8,1], index: 2, kind: input, shape index: {}]   ;;  %s2462_s3 = inlined_call_operand.vmem [shape: f32[8,16,8], index: 3, kind: input, shape index: {}]   ;;  %s2463_s4 = inlined_call_operand.vmem [shape: f32[8,8,16], index: 4, kind: input, shape index: {}]   ;;  %s2464_s5 = inlined_call_operand.vmem [shape: f32[4,64], index: 5, kind: input, shape index: {}]   ;;  %s2465_s6 = inlined_call_operand.vmem [shape: f32[10,32], index: 6, kind: input, shape index: {}]   ;;  %s2466_s7 = inlined_call_operand.vmem [shape: f32[32,80], index: 7, kind: input, shape index: {}]   ;;  %s2467_s8 = inlined_call_operand.vmem [shape: f32[4,32], index: 8, kind: input, shape index: {}]   ;;  %s2468_s9 = inlined_call_operand.vmem [shape: f32[16,16], index: 9, kind: input, shape index: {}]   ;;  %s2469_s10 = inlined_call_operand.vmem [shape: f32[16,68], index: 10, kind: input, shape index: {}]   ;;  %s2470_s11 = inlined_call_operand.vmem [shape: f32[64,4], index: 11, kind: input, shape index: {}]   ;;  %s2471_s12 = inlined_call_operand.vmem [shape: f32[8,1,4], index: 12, kind: output, shape index: {}]  }
   0x1 LB: > { %s1822_s22 = sadd.s32 4294967295, %s2067_s21   ;;  %p1826_p0 = scmp.ge.s32.totalorder %s2067_s21, 1  ;;  %s2067_s21 = sphi %s2152_s21, %s22_s21  }
   0x2   : > { %p399_p1 = scmp.lt.s32.totalorder %s2067_s21, 9 }
   0x4   : > { %p400_p2 = pnand %p1826_p0, %p399_p1 }
   0x5   : > { %p456_p3 = scmp.lt.s32.totalorder (!%p400_p2), %s1822_s22, 7  ;;  %s2069_s27 = smov (!%p400_p2), 127  }
   0x6   : > { %403 = sbr.rel (%p400_p2) target bundleno = 2544 (0x9f0), region = 68  ;;  %s2070_s28 = smov (!%p400_p2), 126  }
   0x7   : > { %s2072_s15 = smov (!%p400_p2), 1   ;;  %s2074_s16 = smov (!%p400_p2), 2  }
   0x8   : > { %s2084_s30 = smov (!%p400_p2), 64  }
   0xb   : > { %s2477_s22 = smov (!%p456_p3, %s1822_s22), 7  ;;  %v2071_v4 = vmov 0   ;;  %v2073_v24 = vmov 1   ;;  %v852_v45 = vld [vmem:[%s2465_s6 + $0x8] sm:$0x3]  ;;  %vm860_vm0 = vcmask 1041408  }
   0xc   : > { %s1868_s23 = sshll.u32 %s2477_s22, 4  ;;  %2025 = vset.pattern.permute.xlu0 %v2071_v4  ;;  %2026 = vset.pattern.permute.xlu1 %v2071_v4  ;;  %s2179_s29 = sshll.u32 %s2477_s22, 3  ;;  %v851_v47 = vld [vmem:[%s2465_s6] sm:$0xff]  ;;  %v2075_v57 = vmov 683565275  }
   0xd   : > { %s460_s26 = scalar_lea.vmem %s2459_s0, %s1868_s23  ;;  %s468_s14 = scalar_lea.vmem %s2461_s2, %s2179_s29  ;;  %1911 = vmatprep.subr.msk.mxu0 %vm860_vm0, %v852_v45  ;;  %v2076_v59 = vmov 2475754826   ;;  %v2077_v61 = vmov 2131351028  }
   0xe   : > { %v2168_v0 = vld [vmem:[%s460_s26] sm:$0xff]  ;;  %v2170_v1 = vld [vmem:[%s460_s26 + $0x8] sm:$0xff]  ;;  %1912 = vmatpush3.msk.msra.mxu0 %vm860_vm0, %v852_v45  ;;  %s464_s26 = scalar_lea.vmem %s2460_s1, %s2179_s29  ;;  %s473_s25 = scalar_lea.vmem %s2462_s3, %s1868_s23 }
   0xf   : > { %v483_v2 = vmul.f32 %v2168_v0, %v2168_v0  ;;  %v484_v3 = vmul.f32 %v2170_v1, %v2170_v1  ;;  %v1053_v23 = vld [vmem:[%s468_s14] sm:$0xff]  ;;  %1913 = vmatprep.subr.mxu0 %v851_v47  ;;  %s477_s23 = scalar_lea.vmem %s2463_s4, %s2179_s29  ;;  %s2086_s14 = smov 112  }
  0x10   : > { %1914 = vmatpush3.msra.mxu0 %v851_v47  ;;  %s480_s18 = scalar_lea.vmem %s2471_s12, %s2477_s22 }
  0x11   : > { %487 = vrot.lane.b32.xlu0 %v483_v2, %s2069_s27  ;;  %495 = vrot.lane.b32.xlu1 %v483_v2, %s2070_s28 }
  0x15   : > { %489 = vrot.lane.b32.xlu0 %v484_v3, %s2069_s27  ;;  %497 = vrot.lane.b32.xlu1 %v484_v3, %s2070_s28 }
  0x83   : > { %v488_v5 = vpop.permute.xlu0 %487  ;;  %v496_v6 = vpop.permute.xlu1 %495 }
  0x84   : > { %v493_v7 = vadd.f32 %v488_v5, %v483_v2 }
  0x86   : > { %v501_v8 = vadd.f32 %v496_v6, %v493_v7  ;;  %v2079_v6 = vmov 920167782  }
  0x87   : > { %v490_v9 = vpop.permute.xlu0 %489  ;;  %v498_v10 = vpop.permute.xlu1 %497 }
  0x88   : > { %v503_v11 = vadd.f32 1e-12, %v501_v8  ;;  %v494_v12 = vadd.f32 %v490_v9, %v484_v3  ;;  %v2078_v3 = vmov 2102212464  }
  0x8a   : > { %2033 = vrsqrt.f32 %v503_v11  ;;  %v502_v13 = vadd.f32 %v498_v10, %v494_v12 }
  0x8c   : > { %v504_v14 = vadd.f32 1e-12, %v502_v13 }
  0x8e   : > { %2035 = vrsqrt.f32 %v504_v14 }
  0x97   : > { %v2034_v15 = vpop.eup %2033 }
  0x98   : > { %v507_v16 = vmul.f32 %v2034_v15, %v503_v11  ;;  %v571_v42 = vmul.f32 %v2034_v15, %v2168_v0  ;;  %v2080_v11 = vmov 1326507024  }
  0x9a   : > { %v591_v17 = vmul.f32 0.4, %v507_v16  ;;  %831 = vperm.xlu0 %2025, %v507_v16  }
  0x9b   : > { %v2181_v18 = vpop.eup %2035 }
  0x9c   : > { %v1838_v19 = vadd.f32 -1.0, %v591_v17  ;;  %v508_v20 = vmul.f32 %v2181_v18, %v504_v14 }
  0x9e   : > { %v595_v21 = vmul.f32 2.0, %v1838_v19  ;;  %v592_v22 = vmul.f32 0.4, %v508_v20  ;;  %515 = vrot.lane.b32.xlu0 %v2034_v15, %s2072_s15  ;;  %836 = vperm.xlu1 %2026, %v508_v20  }
  0x9f   : > { %2027 = vset.pattern.permute.xlu0 %v2073_v24 }
  0xa0   : > { %v597_v25 = vmax.f32 %v595_v21, -1.0  ;;  %v1839_v26 = vadd.f32 -1.0, %v592_v22 }
  0xa2   : > { %v599_v27 = vmin.f32 %v597_v25, 0.0  ;;  %v596_v28 = vmul.f32 2.0, %v1839_v26  ;;  %545 = vrot.lane.b32.xlu0 %v2034_v15, %s2074_s16  ;;  %1059 = vperm.xlu1 %2026, %v1053_v23  }
  0xa4   : > { %v2188_v29 = vmul.f32 3.1415927, %v599_v27  ;;  %v598_v30 = vmax.f32 %v596_v28, -1.0 }
  0xa6   : > { %v606_v31 = vand.u32 2139095040, %v2188_v29  ;;  %v600_v32 = vmin.f32 %v598_v30, 0.0  ;;  %517 = vrot.lane.b32.xlu1 %v2181_v18, %s2072_s15  ;;  %v603_v33 = vand.u32 2147483647, %v2188_v29  ;;  %vm605_vm15 = vcmp.lt.s32.totalorder %v2188_v29, 0 }
  0xa8   : > { %v607_v34 = vshrl.u32 %v606_v31, 23  ;;  %v2193_v35 = vmul.f32 3.1415927, %v600_v32  ;;  %v610_v36 = vand.u32 8388607, %v603_v33 }
  0xa9   : > { %vm2269_vm0 = vcmp.le.f32.partialorder %v603_v33, 0.7853982  ;;  %v951_v33 = vld [vmem:[%s2466_s7] sm:$0xff] }
  0xaa   : > { %v1840_v37 = vadd.s32 4294967169, %v607_v34  ;;  %v709_v38 = vand.u32 2139095040, %v2193_v35  ;;  %547 = vrot.lane.b32.xlu1 %v2181_v18, %s2074_s16  ;;  %v706_v39 = vand.u32 2147483647, %v2193_v35  ;;  %v611_v44 = vor.u32 8388608, %v610_v36 }
  0xac   : > { %v613_v40 = vadd.s32 1, %v1840_v37  ;;  %v710_v41 = vshrl.u32 %v709_v38, 23  ;;  %v713_v43 = vand.u32 8388607, %v706_v39  ;;  %v2209_v52 = vshll.u32 %v611_v44, 8 }
  0xae   : > { %vm614_vm1 = vcmp.gt.s32.totalorder %v613_v40, 0  ;;  %v1844_v46 = vadd.s32 4294967169, %v710_v41  ;;  %575 = vperm.xlu1 %2026, %v571_v42   ;;  %v714_v48 = vor.u32 8388608, %v713_v43 }
  0xaf   : > { %v615_v49 = vsel %vm614_vm1, %v613_v40, 0  ;;  %vm708_vm1 = vcmp.lt.s32.totalorder %v2193_v35, 0 }
  0xb0   : > { %v617_v50 = vand.u32 31, %v615_v49  ;;  %v716_v51 = vadd.s32 1, %v1844_v46  ;;  %v616_v53 = vshrl.u32 %v615_v49, 5  ;;  %v2211_v55 = vshll.u32 %v714_v48, 8 }
  0xb2   : > { %v618_v54 = vsub.s32 32, %v617_v50  ;;  %vm717_vm2 = vcmp.gt.s32.totalorder %v716_v51, 0  ;;  %2028 = vset.pattern.permute.xlu1 %v2073_v24  ;;  %v620_v58 = vshll.u32 %v2075_v57, %v617_v50  ;;  %v623_v60 = vshll.u32 %v2076_v59, %v617_v50 }
  0xb3   : > { %v718_v56 = vsel %vm717_vm2, %v716_v51, 0  ;;  %v626_v62 = vshll.u32 %v2077_v61, %v617_v50  ;;  %v629_v5 = vshll.u32 %v2078_v3, %v617_v50  ;;  %v632_v7 = vshll.u32 %v2079_v6, %v617_v50 }
  0xb4   : > { %v720_v63 = vand.u32 31, %v718_v56  ;;  %v621_v2 = vshrl.u32 %v2076_v59, %v618_v54  ;;  %v624_v8 = vshrl.u32 %v2077_v61, %v618_v54  ;;  %v627_v9 = vshrl.u32 %v2078_v3, %v618_v54 }
  0xb5   : > { %v630_v10 = vshrl.u32 %v2079_v6, %v618_v54  ;;  %v633_v12 = vshrl.u32 %v2080_v11, %v618_v54  ;;  %v2213_v13 = vshrl.u32 %v718_v56, 5  ;;  %v619_v15 = vshrl.u32 %v2075_v57, %v618_v54 }
  0xb6   : > { %v721_v14 = vsub.s32 32, %v720_v63  ;;  %v622_v16 = vor.u32 %v621_v2, %v620_v58  ;;  %v625_v17 = vor.u32 %v624_v8, %v623_v60  ;;  %v628_v19 = vor.u32 %v627_v9, %v626_v62 }
  0xb7   : > { %v631_v20 = vor.u32 %v630_v10, %v629_v5  ;;  %v634_v21 = vor.u32 %v633_v12, %v632_v7  ;;  %vm635_vm3 = vcmp.lt.s32.totalorder %v616_v53, 1  ;;  %vm636_vm4 = vcmp.lt.s32.totalorder %v616_v53, 2 }
  0xb8   : > { %vm637_vm5 = vcmp.lt.s32.totalorder %v616_v53, 3  ;;  %vm638_vm6 = vcmp.lt.s32.totalorder %v616_v53, 4  ;;  %v643_v23 = vsel %vm635_vm3, %v622_v16, %v625_v17  ;;  %v647_v25 = vsel %vm635_vm3, %v625_v17, %v628_v19 }
  0xb9   : > { %v640_v22 = vsel %vm638_vm6, %v628_v19, 2102212464  ;;  %v644_v24 = vsel %vm638_vm6, %v631_v20, 920167782  ;;  %v639_v26 = vsel %vm635_vm3, %v619_v15, %v622_v16  ;;  %v648_v30 = vsel %vm638_vm6, %v634_v21, 1326507024 }
  0xba   : > { %v641_v27 = vsel %vm637_vm5, %v625_v17, %v640_v22  ;;  %v645_v28 = vsel %vm637_vm5, %v628_v19, %v644_v24  ;;  %v649_v32 = vsel %vm637_vm5, %v631_v20, %v648_v30  ;;  %v723_v34 = vshll.u32 %v2075_v57, %v720_v63 }
  0xbb   : > { %v646_v31 = vsel %vm636_vm4, %v643_v23, %v645_v28  ;;  %v724_v36 = vshrl.u32 %v2076_v59, %v721_v14  ;;  %v650_v37 = vsel %vm636_vm4, %v647_v25, %v649_v32  ;;  %v722_v41 = vshrl.u32 %v2075_v57, %v721_v14 }
  0xbc   : > { %v2218_v38 = vmul.u32.u64.low %v2209_v52, %v646_v31  ;;  %v2219_v40 = vmul.u32.u64.high %v2209_v52, %v646_v31, %v2218_v38  ;;  %v642_v42 = vsel %vm636_vm4, %v639_v26, %v641_v27  ;;  %v726_v46 = vshll.u32 %v2076_v59, %v720_v63 }
  0xbd   : > { %v2224_v43 = vmul.u32.u64.low %v2209_v52, %v650_v37  ;;  %v2225_v44 = vmul.u32.u64.high %v2209_v52, %v650_v37, %v2224_v43  ;;  %v725_v45 = vor.u32 %v724_v36, %v723_v34  ;;  %v727_v47 = vshrl.u32 %v2077_v61, %v721_v14 }
  0xbe   : > { %v729_v48 = vshll.u32 %v2077_v61, %v720_v63  ;;  %v730_v49 = vshrl.u32 %v2078_v3, %v721_v14  ;;  %v732_v50 = vshll.u32 %v2078_v3, %v720_v63  ;;  %v733_v51 = vshrl.u32 %v2079_v6, %v721_v14 }
  0xbf   : > { %v735_v54 = vshll.u32 %v2079_v6, %v720_v63  ;;  %v736_v56 = vshrl.u32 %v2080_v11, %v721_v14  ;;  %v658_v58 = vmul.u32 %v2209_v52, %v642_v42  ;;  %v661_v60 = vadd.s32 1, %v2219_v40 }
  0xc0   : > { %v728_v57 = vor.u32 %v727_v47, %v726_v46  ;;  %v731_v53 = vor.u32 %v730_v49, %v729_v48  ;;  %vm660_vm7 = vc.u32 %v2225_v44, %v2218_v38  ;;  %v734_v62 = vor.u32 %v733_v51, %v732_v50 }
  0xc1   : > { %v737_v2 = vor.u32 %v736_v56, %v735_v54  ;;  %vm738_vm8 = vcmp.lt.s32.totalorder %v2213_v13, 1  ;;  %v662_v59 = vsel %vm660_vm7, %v661_v60, %v2219_v40  ;;  %vm739_vm9 = vcmp.lt.s32.totalorder %v2213_v13, 2 }
  0xc2   : > { %vm740_vm10 = vcmp.lt.s32.totalorder %v2213_v13, 3  ;;  %vm741_vm11 = vcmp.lt.s32.totalorder %v2213_v13, 4  ;;  %v663_v52 = vadd.s32 %v662_v59, %v658_v58  ;;  %v746_v63 = vsel %vm738_vm8, %v725_v45, %v728_v57 }
  0xc3   : > { %v743_v61 = vsel %vm741_vm11, %v731_v53, 2102212464  ;;  %v747_v3 = vsel %vm741_vm11, %v734_v62, 920167782  ;;  %v742_v5 = vsel %vm738_vm8, %v722_v41, %v725_v45  ;;  %v750_v7 = vsel %vm738_vm8, %v728_v57, %v731_v53 }
  0xc4   : > { %v748_v6 = vsel %vm740_vm10, %v731_v53, %v747_v3  ;;  %v751_v8 = vsel %vm741_vm11, %v737_v2, 1326507024  ;;  %v664_v9 = vadd.s32 536870912, %v663_v52  ;;  %v744_v10 = vsel %vm740_vm10, %v728_v57, %v743_v61 }
  0xc5   : > { %v749_v11 = vsel %vm739_vm9, %v746_v63, %v748_v6  ;;  %v752_v12 = vsel %vm740_vm10, %v734_v62, %v751_v8  ;;  %v745_v21 = vsel %vm739_vm9, %v742_v5, %v744_v10  ;;  %v2081_v22 = vmov 0.0  }
  0xc6   : > { %v753_v14 = vsel %vm739_vm9, %v750_v7, %v752_v12  ;;  %v2241_v15 = vmul.u32.u64.low %v2211_v55, %v749_v11  ;;  %v2242_v16 = vmul.u32.u64.high %v2211_v55, %v749_v11, %v2241_v15  ;;  %v2244_v17 = vshrl.u32 %v664_v9, 30  ;;  %1929 = vmatprep.subr.mxu0 %v2081_v22 }
  0xc7   : > { %v2247_v19 = vmul.u32.u64.low %v2211_v55, %v753_v14  ;;  %v2248_v20 = vmul.u32.u64.high %v2211_v55, %v753_v14, %v2247_v19  ;;  %v761_v25 = vmul.u32 %v2211_v55, %v745_v21  ;;  %v659_v51 = vadd.s32 %v2218_v38, %v2225_v44 }
  0xc8   : > { %v666_v23 = vshll.u32 %v2244_v17, 30  ;;  %v764_v24 = vadd.s32 1, %v2242_v16  ;;  %v825_v14 = vlaneseq  ;;  %vm2281_vm2 = vcmp.le.f32.partialorder %v706_v39, 0.7853982 }
  0xc9   : > { %vm763_vm12 = vc.u32 %v2248_v20, %v2241_v15  ;;  %v762_v62 = vadd.s32 %v2241_v15, %v2248_v20  ;;  %vm695_vm8 = vweird.f32 %v2188_v29  ;;  %vm798_vm10 = vweird.f32 %v2193_v35 }
  0xca   : > { %v765_v26 = vsel %vm763_vm12, %v764_v24, %v2242_v16  ;;  %v667_v27 = vsub.s32 %v663_v52, %v666_v23  ;;  %v826_v19 = vand.u32 127, %v825_v14  ;;  %v689_v23 = vsub.s32 4, %v2244_v17 }
  0xcb   : > { %v766_v28 = vadd.s32 %v765_v26, %v761_v25  ;;  %vm853_vm11 = vcmask 80896   ;;  %vm1067_vm12 = vcmask 1043456  }
  0xcc   : > { %v669_v31 = vsub.s32 0, %v667_v27  ;;  %v827_v21 = vcvt.s32.f32 %v826_v19  ;;  %v690_v26 = vsel %vm605_vm15, %v689_v23, %v2244_v17  ;;  %v952_v19 = vld [vmem:[%s2466_s7 + $0x8] sm:$0xff] }
  0xcd   : > { %v767_v30 = vadd.s32 536870912, %v766_v28 }
  0xce   : > { %v1841_v34 = vmin.u32 %v669_v31, %v667_v27  ;;  %v828_v24 = vmul.f32 0.2777778, %v827_v21 }
  0xcf   : > { %v2258_v32 = vshrl.u32 %v767_v30, 30  ;;  %v692_v30 = vsel %vm2269_vm0, 0, %v690_v26 }
  0xd0   : > { %v671_v40 = vclz %v1841_v34 }
  0xd1   : > { %v769_v13 = vshll.u32 %v2258_v32, 30  ;;  %v792_v25 = vsub.s32 4, %v2258_v32 }
  0xd2   : > { %v1842_v42 = vadd.s32 4294967294, %v671_v40  ;;  %v696_v40 = vand.u32 3, %v692_v30 }
  0xd3   : > { %v770_v36 = vsub.s32 %v766_v28, %v769_v13  ;;  %v793_v31 = vsel %vm708_vm1, %v792_v25, %v2258_v32 }
  0xd4   : > { %vm1843_vm13 = vcmp.lt.s32.totalorder %v1842_v42, 0  ;;  %vm698_vm3 = vcmp.eq.s32.totalorder %v696_v40, 0  ;;  %vm701_vm4 = vcmp.eq.s32.totalorder %v696_v40, 2  ;;  %vm697_vm5 = vcmp.lt.s32.totalorder %v696_v40, 2 }
  0xd5   : > { %v772_v37 = vsub.s32 0, %v770_v36  ;;  %v674_v45 = vsel %vm1843_vm13, 0, %v1842_v42  ;;  %v795_v42 = vsel %vm2281_vm2, 0, %v793_v31  ;;  %vm2083_vm13 = vmmov 0  }
  0xd6   : > { %v679_v46 = vsub.s32 4294967266, %v674_v45  ;;  %v675_v50 = vsub.s32 32, %v674_v45  ;;  %v676_v57 = vshll.u32 %v667_v27, %v674_v45 }
  0xd7   : > { %v1845_v41 = vmin.u32 %v772_v37, %v770_v36 }
  0xd8   : > { %v680_v48 = vadd.s32 127, %v679_v46  ;;  %v677_v58 = vshrl.u32 %v659_v51, %v675_v50  ;;  %v799_v50 = vand.u32 3, %v795_v42 }
  0xd9   : > { %v774_v43 = vclz %v1845_v41 }
  0xda   : > { %v681_v54 = vshll.u32 %v680_v48, 23  ;;  %v678_v59 = vor.u32 %v677_v58, %v676_v57  ;;  %vm801_vm6 = vcmp.eq.s32.totalorder %v799_v50, 0  ;;  %vm804_vm7 = vcmp.eq.s32.totalorder %v799_v50, 2 }
  0xdb   : > { %v1846_v55 = vadd.s32 4294967294, %v774_v43  ;;  %vm800_vm9 = vcmp.lt.s32.totalorder %v799_v50, 2  ;;  %v1834_v50 = vld [vmem:[%s2464_s5 + $0x1] ss:$0 sm:$0xff] }
  0xdc   : > { %v682_v53 = vor.u32 4788187, %v681_v54  ;;  %v685_v5 = vcvt.s32.f32 %v678_v59 }
  0xdd   : > { %vm1847_vm14 = vcmp.lt.s32.totalorder %v1846_v55, 0 }
  0xde   : > { %v777_v47 = vsel %vm1847_vm14, 0, %v1846_v55  ;;  %v683_v61 = vand.u32 2147483647, %v682_v53  ;;  %vm1063_vm14 = vcmask 31744  }
  0xdf   : > { %v782_v49 = vsub.s32 4294967266, %v777_v47  ;;  %v778_v60 = vsub.s32 32, %v777_v47  ;;  %v779_v63 = vshll.u32 %v770_v36, %v777_v47 }
  0xe0   : > { %v686_v7 = vmul.f32 %v685_v5, %v683_v61 }
  0xe1   : > { %v783_v56 = vadd.s32 127, %v782_v49  ;;  %v780_v52 = vshrl.u32 %v762_v62, %v778_v60  ;;  %v2082_v62 = vmov 2  }
  0xe2   : > { %v687_v38 = vxor.u32 2147483648, %v686_v7 }
  0xe3   : > { %v784_v2 = vshll.u32 %v783_v56, 23  ;;  %v781_v6 = vor.u32 %v780_v52, %v779_v63 }
  0xe4   : > { %v688_v10 = vsel %vm605_vm15, %v687_v38, %v686_v7  ;;  %vm1141_vm15 = vcmask 64512  }
  0xe5   : > { %v785_v3 = vor.u32 4788187, %v784_v2  ;;  %v788_v9 = vcvt.s32.f32 %v781_v6  ;;  %v691_v15 = vsel %vm2269_vm0, %v2188_v29, %v688_v10  ;;  %vm955_vm0 = vcmask 261120  }
  0xe6   : > { %2037 = vcosq.f32 %v691_v15 }
  0xe7   : > { %v786_v8 = vand.u32 2147483647, %v785_v3  ;;  %2039 = vsinq.f32 %v691_v15 }
  0xe9   : > { %v789_v44 = vmul.f32 %v788_v9, %v786_v8 }
  0xeb   : > { %v790_v11 = vxor.u32 2147483648, %v789_v44 }
  0xed   : > { %v791_v16 = vsel %vm708_vm1, %v790_v11, %v789_v44  ;;  %v572_v11 = vmul.f32 %v2181_v18, %v2170_v1  ;;  %v953_v18 = vld [vmem:[%s2466_s7 + $0x10] sm:$0xff]  ;;  %vm1225_vm1 = vcmask 130048  }
  0xee   : > { %v794_v20 = vsel %vm2281_vm2, %v2193_v35, %v791_v16  ;;  %v1054_v35 = vld [vmem:[%s2467_s8] sm:$0xf]  ;;  %vm1555_vm2 = vcmask 523264  }
  0xef   : > { %2041 = vcosq.f32 %v794_v20  ;;  %v1052_v16 = vld [vmem:[%s464_s26] sm:$0xff]  ;;  %s2085_s26 = smov 16  }
  0xf0   : > { %2043 = vsinq.f32 %v794_v20  ;;  %v2339_v20 = vld [vmem:[%s473_s25] sm:$0xff] }
  0xf3   : > { %v2038_v27 = vpop.eup %2037 }
  0xf4   : > { %v2040_v13 = vpop.eup %2039  ;;  %v702_v41 = vxor.u32 2147483648, %v2038_v27 }
  0xf5   : > { %v699_v45 = vxor.u32 2147483648, %v2040_v13 }
  0xf6   : > { %v703_v58 = vsel %vm701_vm4, %v702_v41, %v2040_v13  ;;  %vm1725_vm4 = vcmask 24576  }
  0xf7   : > { %v700_v56 = vsel %vm698_vm3, %v2038_v27, %v699_v45  ;;  %v2346_v27 = vld [vmem:[%s473_s25 + $0x8] sm:$0xff]  ;;  %vm1713_vm3 = vcmask 556544  }
  0xf8   : > { %v704_v59 = vsel %vm697_vm5, %v700_v56, %v703_v58  ;;  %v1835_v58 = vld [vmem:[%s2464_s5] ss:$0 sm:$0xff] }
  0xf9   : > { %v705_v6 = vsel %vm695_vm8, nan, %v704_v59 }
  0xfa   : > { %v809_v44 = vsub.f32 1.0, %v705_v6 }
  0xfc   : > { %v2042_v46 = vpop.eup %2041  ;;  %v811_v10 = vmul.f32 0.5, %v809_v44 }
  0xfd   : > { %v2044_v47 = vpop.eup %2043  ;;  %v805_v57 = vxor.u32 2147483648, %v2042_v46 }
  0xfe   : > { %v802_v60 = vxor.u32 2147483648, %v2044_v47 }
  0xff   : > { %v806_v3 = vsel %vm804_vm7, %v805_v57, %v2044_v47 }
 0x100   : > { %v803_v63 = vsel %vm801_vm6, %v2042_v46, %v802_v60 }
 0x101   : > { %v807_v9 = vsel %vm800_vm9, %v803_v63, %v806_v3 }
 0x102   : > { %v808_v29 = vsel %vm798_vm10, nan, %v807_v9 }
 0x103   : > { %v810_v12 = vsub.f32 1.0, %v808_v29 }
 0x115   : > { %v832_v39 = vpop.permute.xlu0 %831 }
 0x116   : > { %v839_v28 = vsub.f32 %v832_v39, %v828_v24 }
 0x118   : > { %v841_v34 = vmul.f32 3.6, %v839_v28 }
 0x119   : > { %v837_v36 = vpop.permute.xlu1 %836  ;;  %v516_v37 = vpop.permute.xlu0 %515 }
 0x11a   : > { %v843_v17 = vmul.f32 %v841_v34, %v841_v34  ;;  %v840_v43 = vsub.f32 %v837_v36, %v828_v24  ;;  %v521_v55 = vmul.f32 %v516_v37, %v2168_v0 }
 0x11c   : > { %v845_v48 = vsub.f32 0.0, %v843_v17  ;;  %v842_v49 = vmul.f32 3.6, %v840_v43  ;;  %525 = vperm.xlu0 %2027, %v521_v55   ;;  %v1056_v17 = vld [vmem:[%s2468_s9 + $0x8] sm:$0xff]  ;;  %v1055_v43 = vld [vmem:[%s2468_s9] sm:$0xff] }
 0x11d   : > { %v2301_v32 = vpop.permute.xlu1 %1059  ;;  %v546_v5 = vpop.permute.xlu0 %545 }
 0x11e   : > { %v847_v51 = vmul.f32 1.442695, %v845_v48  ;;  %v844_v54 = vmul.f32 %v842_v49, %v842_v49  ;;  %v551_v38 = vmul.f32 %v546_v5, %v2168_v0  ;;  %v812_v0 = vmul.f32 0.5, %v810_v12 }
 0x120   : > { %2045 = vpow2.f32 %v847_v51  ;;  %v846_v53 = vsub.f32 0.0, %v844_v54  ;;  %2031 = vset.pattern.permute.xlu0 %v2082_v62  ;;  %v1836_v51 = vld [vmem:[%s2464_s5 + $0x2] ss:$0 sm:$0xff] }
 0x121   : > { %v518_v2 = vpop.permute.xlu1 %517 }
 0x122   : > { %v849_v52 = vmul.f32 1.442695, %v846_v53  ;;  %v522_v61 = vmul.f32 %v518_v2, %v2170_v1  ;;  %v1837_v2 = vld [vmem:[%s2464_s5 + $0x3] ss:$0 sm:$0xff] }
 0x124   : > { %2047 = vpow2.f32 %v849_v52  ;;  %530 = vperm.xlu1 %2028, %v522_v61  }
 0x125   : > { %v548_v7 = vpop.permute.xlu1 %547 }
 0x126   : > { %v552_v8 = vmul.f32 %v548_v7, %v2170_v1  ;;  %v1062_v1 = vmul.f32 %v2301_v32, %v1052_v16 }
 0x128   : > { %2029 = vset.pattern.permute.xlu1 %v2082_v62  ;;  %560 = vperm.xlu0 %2031, %v552_v8  }
 0x129   : > { %555 = vperm.xlu1 %2029, %v551_v38   ;;  %v576_v46 = vpop.permute.xlu1 %575 }
 0x12a   : > { %v587_v5 = vmul.f32 %v1837_v2, %v576_v46  ;;  %v1396_v46 = vld [vmem:[%s2470_s11 + $0x10] sm:$0xff] }
 0x12c   : > { %2032 = vset.pattern.permute.xlu0 %v2071_v4 }
 0x12d   : > { %v2046_v14 = vpop.eup %2045  ;;  %815 = vperm.xlu0 %2032, %v811_v10   ;;  %2030 = vset.pattern.permute.xlu1 %v2071_v4  ;;  %v954_v4 = vld [vmem:[%s2466_s7 + $0x18] sm:$0xff] }
 0x12e   : > { %1915 = vmatprep.mubr.msk.f32.mxu0 %vm853_vm11, %v2046_v14  ;;  %580 = vperm.xlu1 %2030, %v572_v11  }
 0x12f   : > { %1918 = vmatprep.subr.mxu1 %v954_v4 }
 0x130   : > { %1919 = vmatpush3.msra.mxu1 %v954_v4 }
 0x131   : > { %v2048_v15 = vpop.eup %2047  ;;  %1920 = vmatprep.subr.mxu1 %v953_v18 }
 0x132   : > { %1916 = vmatmul.mubr.msk.f32.vlgmr.msra.gmra.mxu0 %vm853_vm11, %v2048_v15  ;;  %820 = vperm.xlu1 %2030, %v812_v0  }
 0x133   : > { %1930 = vmatpush3.msk.msra.mxu0 %vm1067_vm12, %v1054_v35  ;;  %1931 = vmatprep.mubr.msk.f32.mxu0 %vm2083_vm13, %v2081_v22 }
 0x134   : > { %1921 = vmatpush3.msra.mxu1 %v953_v18 }
 0x135   : > { %1922 = vmatprep.subr.mxu1 %v952_v19 }
 0x136   : > { %1932 = vmatmul.mubr.msk.f32.vlgmr.msra.gmra.mxu0 %vm1063_vm14, %v1062_v1  ;;  %1923 = vmatpush3.msra.mxu1 %v952_v19  ;;  %v2395_v1 = vld [vmem:[%s477_s23] sm:$0xff] }
 0x137   : > { %1924 = vmatprep.subr.mxu1 %v951_v33  ;;  %1936 = vmatprep.mubr.msk.f32.mxu0 %vm1141_vm15, %v2339_v20 }
 0x138   : > { %1925 = vmatpush3.msra.mxu1 %v951_v33 }
 0x139   : > { %1953 = vmatprep.subr.mxu1 %v2081_v22 }
 0x197   : > { %v526_v48 = vpop.permute.xlu0 %525 }
 0x198   : > { %v537_v54 = vmul.f32 %v1834_v50, %v526_v48  ;;  %v1394_v48 = vld [vmem:[%s2470_s11] sm:$0xff] }
 0x19a   : > { %v543_v59 = vadd.f32 %v1835_v58, %v537_v54 }
 0x19f   : > { %v531_v47 = vpop.permute.xlu1 %530 }
 0x1a0   : > { %v538_v60 = vmul.f32 %v1834_v50, %v531_v47  ;;  %v1395_v47 = vld [vmem:[%s2470_s11 + $0x8] sm:$0xff] }
 0x1a2   : > { %v544_v52 = vadd.f32 %v1835_v58, %v538_v60 }
 0x1a3   : > { %v561_v56 = vpop.permute.xlu0 %560 }
 0x1a4   : > { %v556_v49 = vpop.permute.xlu1 %555  ;;  %v568_v62 = vmul.f32 %v1836_v51, %v561_v56 }
 0x1a5   : > { %v567_v57 = vmul.f32 %v1836_v51, %v556_v49 }
 0x1a6   : > { %v570_v3 = vadd.f32 %v568_v62, %v544_v52 }
 0x1a7   : > { %v569_v63 = vadd.f32 %v567_v57, %v543_v59 }
 0x1a8   : > { %v816_v6 = vpop.permute.xlu0 %815 }
 0x1a9   : > { %v581_v53 = vpop.permute.xlu1 %580  ;;  %v589_v8 = vadd.f32 %v587_v5, %v569_v63 }
 0x1aa   : > { %v588_v61 = vmul.f32 %v1837_v2, %v581_v53 }
 0x1ab   : > { %v2383_v10 = vmul.f32 %v816_v6, %v589_v8 }
 0x1ac   : > { %v590_v7 = vadd.f32 %v588_v61, %v570_v3 }
 0x1ad   : > { %v821_v9 = vpop.permute.xlu1 %820 }
 0x1ae   : > { %v2381_v38 = vmul.f32 %v821_v9, %v590_v7 }
 0x1f2   : > { %v1917_v21 = vpop.f32.mrf.mxu0 }
 0x1f3   : > { %v940_v23 = vsub.f32 0.0, %v1917_v21 }
 0x1f4   : > { %v930_v24 = vpop.f32.mrf.mxu0 }
 0x1f5   : > { %v943_v25 = vmul.f32 1.442695, %v940_v23  ;;  %v939_v26 = vsub.f32 0.0, %v930_v24  ;;  %v1392_v23 = vld [vmem:[%s2469_s10] sm:$0xff] }
 0x1f6   : > { %v2344_v39 = vpop.f32.mrf.mxu0 }
 0x1f7   : > { %2049 = vpow2.f32 %v943_v25  ;;  %v941_v28 = vmul.f32 1.442695, %v939_v26  ;;  %1934 = vmatprep.subr.mxu0 %v2344_v39 }
 0x1f8   : > { %v1933_v30 = vpop.f32.mrf.mxu0  ;;  %1935 = vmatpush3.msra.mxu0 %v2344_v39 }
 0x1f9   : > { %2051 = vpow2.f32 %v941_v28  ;;  %1937 = vmatmul.mubr.msk.f32.vlgmr.msra.gmra.mxu0 %vm1141_vm15, %v2346_v27  ;;  %1939 = vmatprep.subr.mxu0 %v1056_v17 }
 0x1fa   : > { %1940 = vmatpush3.msra.mxu0 %v1056_v17 }
 0x1fb   : > { %1941 = vmatprep.subr.mxu0 %v1055_v43 }
 0x1fc   : > { %1942 = vmatpush3.msra.mxu0 %v1055_v43 }
 0x1fd   : > { %1946 = vmatprep.subr.mxu0 %v2081_v22 }
 0x204   : > { %v2050_v31 = vpop.eup %2049 }
 0x205   : > { %v946_v13 = vadd.f32 1.0, %v2050_v31 }
 0x206   : > { %v2052_v34 = vpop.eup %2051 }
 0x207   : > { %v945_v36 = vadd.f32 1.0, %v2052_v34  ;;  %2053 = vrcp.f32 %v946_v13 }
 0x209   : > { %2055 = vrcp.f32 %v945_v36 }
 0x214   : > { %v2054_v37 = vpop.eup %2053 }
 0x215   : > { %v950_v42 = vmul.f32 %v2054_v37, %v1917_v21  ;;  %v1393_v21 = vld [vmem:[%s2469_s10 + $0x8] sm:$0xff]  ;;  %v1401_v37 = vld [vmem:[%s2470_s11 + $0x38] sm:$0xff] }
 0x216   : > { %v2056_v40 = vpop.eup %2055 }
 0x217   : > { %v949_v41 = vmul.f32 %v2056_v40, %v930_v24  ;;  %v1399_v40 = vld [vmem:[%s2470_s11 + $0x28] sm:$0xff] }
 0x219   : > { %1926 = vmatprep.mubr.msk.f32.mxu1 %vm955_vm0, %v949_v41  ;;  %v1398_v41 = vld [vmem:[%s2470_s11 + $0x20] sm:$0xff] }
 0x21a   : > { %1927 = vmatmul.mubr.msk.f32.vlgmr.msra.gmra.mxu1 %vm955_vm0, %v950_v42  ;;  %v1397_v42 = vld [vmem:[%s2470_s11 + $0x18] sm:$0xff] }
 0x21b   : > { %1957 = vmatprep.mubr.msk.f32.mxu1 %vm2083_vm13, %v2081_v22  ;;  %1954 = vmatpush3.msra.mxu1 %v1393_v21 }
 0x21c   : > { %1955 = vmatprep.subr.mxu1 %v2081_v22 }
 0x21d   : > { %1956 = vmatpush3.msra.mxu1 %v1392_v23 }
 0x21e   : > { %1965 = vmatprep.subr.mxu1 %v1401_v37 }
 0x2b9   : > { %v1938_v44 = vpop.f32.mrf.mxu0 }
 0x2bb   : > { %v1214_v0 = vpop.f32.mrf.mxu0 }
 0x2da   : > { %v2361_v55 = vpop.f32.mrf.mxu1 }
 0x2db   : > { %1043 = vrot.lane.b32.xlu0 %v2361_v55, %s2084_s30  ;;  %v1038_v50 = vmul.f32 %v2361_v55, %v2381_v38 }
 0x2dc   : > { %v2365_v45 = vpop.f32.mrf.mxu1 }
 0x2dd   : > { %1041 = vrot.lane.b32.xlu1 %v2365_v45, %s2084_s30  ;;  %v1037_v49 = vmul.f32 %v2365_v45, %v2383_v10 }
 0x34d   : > { %v1044_v29 = vpop.permute.xlu0 %1043 }
 0x34e   : > { %v1048_v11 = vmul.f32 %v1044_v29, %v2381_v38 }
 0x34f   : > { %v1042_v12 = vpop.permute.xlu1 %1041 }
 0x350   : > { %v1047_v14 = vmul.f32 %v1042_v12, %v2383_v10  ;;  %v1224_v15 = vmul.f32 %v1938_v44, %v1048_v11 }
 0x352   : > { %v1223_v35 = vmul.f32 %v1214_v0, %v1047_v14 }
 0x354   : > { %1943 = vmatprep.mubr.msk.f32.mxu0 %vm1225_vm1, %v1223_v35 }
 0x355   : > { %1944 = vmatmul.mubr.msk.f32.vlgmr.msra.gmra.mxu0 %vm1225_vm1, %v1224_v15 }
 0x356   : > { %1950 = vmatprep.mubr.msk.f32.mxu0 %vm2083_vm13, %v2081_v22 }
 0x415   : > { %v1945_v16 = vpop.f32.mrf.mxu0 }
 0x416   : > { %1947 = vmatpush3.msra.mxu0 %v1945_v16 }
 0x417   : > { %v1298_v4 = vpop.f32.mrf.mxu0  ;;  %1948 = vmatprep.subr.mxu0 %v2081_v22 }
 0x418   : > { %1949 = vmatpush3.msra.mxu0 %v1298_v4 }
 0x419   : > { %1951 = vmatmul.mubr.msk.f32.vlgmr.msra.gmra.mxu0 %vm1225_vm1, %v2395_v1 }
 0x41a   : > { %1962 = vmatprep.mubr.msk.f32.mxu0 %vm1141_vm15, %v2339_v20 }
 0x4d9   : > { %v1376_v18 = vpop.f32.mrf.mxu0 }
 0x4da   : > { %v1380_v19 = vmul.f32 %v1376_v18, %v2301_v32 }
 0x4db   : > { %v1952_v33 = vpop.f32.mrf.mxu0 }
 0x4dc   : > { %1382 = vrot.lane.b32.xlu1 %v1380_v19, %s2085_s26 }
 0x54e   : > { %v1383_v24 = vpop.permute.xlu1 %1382 }
 0x54f   : > { %v1385_v20 = vadd.f32 %v1383_v24, %v2344_v39  ;;  %v1400_v39 = vld [vmem:[%s2470_s11 + $0x30] sm:$0xff] }
 0x551   : > { %v1386_v25 = vsub.f32 0.0, %v1385_v20 }
 0x553   : > { %v1387_v26 = vmul.f32 1.442695, %v1386_v25 }
 0x555   : > { %2057 = vpow2.f32 %v1387_v26 }
 0x562   : > { %v2058_v28 = vpop.eup %2057 }
 0x563   : > { %v1389_v30 = vadd.f32 1.0, %v2058_v28 }
 0x565   : > { %2059 = vrcp.f32 %v1389_v30 }
 0x572   : > { %v2060_v31 = vpop.eup %2059 }
 0x573   : > { %v1391_v13 = vmul.f32 %v2060_v31, %v1385_v20 }
 0x575   : > { %v1402_v34 = vmul.f32 %v1391_v13, %v2301_v32 }
 0x577   : > { %1404 = vrot.lane.b32.xlu0 %v1402_v34, %s2086_s14 }
 0x5e9   : > { %v1405_v36 = vpop.permute.xlu0 %1404 }
 0x5ea   : > { %1958 = vmatmul.mubr.msk.f32.vlgmr.msra.gmra.mxu1 %vm1225_vm1, %v1405_v36 }
 0x5eb   : > { %1966 = vmatpush3.msra.mxu1 %v1401_v37 }
 0x5ec   : > { %1967 = vmatprep.subr.mxu1 %v1400_v39 }
 0x5ed   : > { %1968 = vmatpush3.msra.mxu1 %v1400_v39 }
 0x5ee   : > { %1969 = vmatprep.subr.mxu1 %v1399_v40 }
 0x5ef   : > { %1970 = vmatpush3.msra.mxu1 %v1399_v40 }
 0x5f0   : > { %1971 = vmatprep.subr.mxu1 %v1398_v41 }
 0x5f1   : > { %1972 = vmatpush3.msra.mxu1 %v1398_v41 }
 0x5f2   : > { %1973 = vmatprep.subr.mxu1 %v1397_v42 }
 0x5f3   : > { %1974 = vmatpush3.msra.mxu1 %v1397_v42 }
 0x5f4   : > { %1975 = vmatprep.subr.mxu1 %v1396_v46 }
 0x5f5   : > { %1976 = vmatpush3.msra.mxu1 %v1396_v46 }
 0x5f6   : > { %1977 = vmatprep.subr.mxu1 %v1395_v47 }
 0x5f7   : > { %1978 = vmatpush3.msra.mxu1 %v1395_v47 }
 0x5f8   : > { %1979 = vmatprep.subr.mxu1 %v1394_v48 }
 0x5f9   : > { %1980 = vmatpush3.msra.mxu1 %v1394_v48 }
 0x6aa   : > { %v1474_v17 = vpop.f32.mrf.mxu1 }
 0x6ab   : > { %1960 = vmatprep.subr.mxu0 %v1474_v17 }
 0x6ac   : > { %v1959_v43 = vpop.f32.mrf.mxu1  ;;  %1961 = vmatpush3.msra.mxu0 %v1474_v17 }
 0x6ad   : > { %1963 = vmatmul.mubr.msk.f32.vlgmr.msra.gmra.mxu0 %vm1141_vm15, %v2346_v27  ;;  %1984 = vmatprep.subr.mxu0 %v2081_v22 }
 0x6ae   : > { %1988 = vmatprep.mubr.msk.f32.mxu0 %vm2083_vm13, %v2081_v22 }
 0x76d   : > { %v1964_v27 = vpop.f32.mrf.mxu0 }
 0x76e   : > { %v1554_v56 = vmul.f32 %v1964_v27, %v1038_v50 }
 0x76f   : > { %v1544_v51 = vpop.f32.mrf.mxu0 }
 0x770   : > { %v1553_v54 = vmul.f32 %v1544_v51, %v1037_v49 }
 0x772   : > { %1981 = vmatprep.mubr.msk.f32.mxu1 %vm1555_vm2, %v1553_v54 }
 0x773   : > { %1982 = vmatmul.mubr.msk.f32.vlgmr.msra.gmra.mxu1 %vm1555_vm2, %v1554_v56 }
 0x833   : > { %v1983_v58 = vpop.f32.mrf.mxu1 }
 0x834   : > { %1985 = vmatpush3.msra.mxu0 %v1983_v58 }
 0x835   : > { %v1628_v60 = vpop.f32.mrf.mxu1  ;;  %1986 = vmatprep.subr.mxu0 %v2081_v22 }
 0x836   : > { %1987 = vmatpush3.msra.mxu0 %v1628_v60 }
 0x837   : > { %1989 = vmatmul.mubr.msk.f32.vlgmr.msra.gmra.mxu0 %vm1225_vm1, %v2395_v1 }
 0x8f7   : > { %v1703_v45 = vpop.f32.mrf.mxu0 }
 0x8f8   : > { %v1707_v57 = vmul.f32 %v1703_v45, %v2301_v32 }
 0x8f9   : > { %v1990_v55 = vpop.f32.mrf.mxu0 }
 0x8fa   : > { %1709 = vrot.lane.b32.xlu1 %v1707_v57, %s2084_s30 }
 0x96c   : > { %v1710_v53 = vpop.permute.xlu1 %1709 }
 0x96d   : > { %v1712_v62 = vadd.f32 %v1710_v53, %v1474_v17 }
 0x96f   : > { %v1714_v2 = vsel %vm1713_vm3, %v1712_v62, 0.0 }
 0x970   : > { %v1715_v59 = vrot.slane %v1714_v2, 4 }
 0x972   : > { %v1716_v52 = vadd.f32 %v1715_v59, %v1714_v2 }
 0x974   : > { %v1717_v61 = vrot.slane %v1716_v52, 2 }
 0x976   : > { %v1718_v63 = vadd.f32 %v1717_v61, %v1716_v52 }
 0x978   : > { %v1719_v22 = vrot.slane %v1718_v63, 1 }
 0x97a   : > { %v1720_v3 = vadd.f32 %v1719_v22, %v1718_v63 }
 0x97c   : > { %1722 = vrot.lane.b32.xlu0 %v1720_v3, %s2084_s30 }
 0x9ee   : > { %v1723_v32 = vpop.permute.xlu0 %1722 }
 0x9ef   : > { %1726 = vst.msk [vmem:[%s480_s18] sm:$0x1] %vm1725_vm4, %v1723_v32 }
 0x9f0 PF: > { %s22_s21 = sadd.s32 1, %s2067_s21  }
 0x9f1   : > { %p19_p4 = scmp.ge.s32.totalorder %s22_s21, 10  }
 0x9f3   :  { %21 = sbr.rel (!%p19_p4) target bundleno = 1 (0x1), region = 110 }

</bundles_post_ra>
